<compile_context>
chip_gen: v6e
topology: v6e:2x2x1
jax: 0.10.0
libtpu: 0.0.40
codegen_flags: <defaults>
</compile_context>

<pallas_src>
import functools

import jax
import jax.numpy as jnp
from jax.experimental import pallas as pl
from jax.experimental.pallas import tpu as pltpu

# ---------------- problem sizes (small, consistent with the module) ----------
B = 2              # batch
T = 8              # sequence length
D = 32             # input_dim (hidden)
TOPK = 3
NUM_EXTERNAL = 16  # num_external
NUM_CALLS = 2      # length of external_list
L = 6              # tokens per external call
NUM_CLASSES = 10
HIDDEN = D * (TOPK + 2)                # dense output dim = 160
F_IN = HIDDEN + NUM_EXTERNAL           # dense input dim  = 176


# ---------------- fused kernel: select_features + one_hot emb + MLP ----------
def fused_kernel(feat_ref, ext_ref, w1_ref, b1_ref, w2_ref, b2_ref, o_ref,
                 x_scratch, *, topk, num_external):
    # feat_ref: (bt, T, D) f32    ext_ref: (bt, NUM_CALLS*L) i32
    # w1_ref:   (F_PAD, HIDDEN)   b1_ref: (1, HIDDEN) f32
    # w2_ref:   (HIDDEN, N_PAD)   b2_ref: (1, N_PAD)  f32
    # o_ref:    (bt, N_PAD) f32   x_scratch: VMEM (bt, F_PAD) f32
    f = feat_ref[...]                                    # (bt, T, D)
    b, t, d = f.shape

    # Zero once so the padding lanes (f_in .. F_PAD) contribute nothing.
    x_scratch[...] = jnp.zeros_like(x_scratch)

    # --- mean over sequence and [CLS] token (static-offset slab writes) ------
    x_scratch[:, 0:d] = jnp.mean(f, axis=1)              # (bt, D)
    x_scratch[:, d:2 * d] = f[:, 0, :]                   # (bt, D)

    # --- top-k values along the sequence axis, descending, via "take max,
    #     knock out one occurrence" (matches torch.topk for finite inputs).
    # TODO(synk): NaN / -inf inputs diverge from torch.topk (exact-equality
    #             knockout); assumed sanitized activations.
    iota_t = jax.lax.broadcasted_iota(jnp.int32, (b, t, d), 1)
    # Loop-invariant broadcasts hoisted out of the unrolled loop (perf review).
    t_sentinel = jnp.full((b, t, d), t, jnp.int32)
    neg_inf_fill = jnp.full((b, t, d), -jnp.inf, jnp.float32)
    work = f
    for k in range(topk):
        m = jnp.max(work, axis=1, keepdims=True)          # (bt, 1, D)
        am = jnp.min(jnp.where(work == m, iota_t, t_sentinel),
                     axis=1, keepdims=True)
        work = jnp.where(iota_t == am, neg_inf_fill, work)
        x_scratch[:, (2 + k) * d:(3 + k) * d] = m[:, 0, :]

    # --- one-hot external embedding, vectorized over all calls at once:
    #     counts[b, c] = #{positions with token == c + 4}
    #     (== sum over calls of one_hot(tok, NE+4).sum(1)[:, 4:])
    tok = ext_ref[...]                                    # (bt, NC*L) int32
    class_ids = jax.lax.broadcasted_iota(
        jnp.int32, (1, 1, num_external), 2) + 4           # (1, 1, NE)
    cmp = (tok[:, :, None] == class_ids).astype(jnp.float32)   # (bt, NC*L, NE)
    counts = jnp.sum(cmp, axis=1)                         # (bt, NE)
    base = (2 + topk) * d
    x_scratch[:, base:base + num_external] = counts

    # --- MLP: dense -> tanh -> last_proj (padded contraction / output dims).
    # Weights may be bf16 (v5e option); accumulation stays f32.
    w1 = w1_ref[...]
    x = x_scratch[...].astype(w1.dtype)                   # (bt, F_PAD)
    h = jnp.dot(x, w1, preferred_element_type=jnp.float32) + b1_ref[...]
    h = jnp.tanh(h)                                       # activation_fn = tanh
    o = jnp.dot(h.astype(w2_ref.dtype), w2_ref[...],
                preferred_element_type=jnp.float32) + b2_ref[...]
    o_ref[...] = o.astype(o_ref.dtype)                    # lane-dense (bt, 128)


# ---------------- one-time parameter preparation ------------------------------
def prepare_params(w1, b1, w2, b2, *, matmul_dtype=jnp.float32):
    """Pad weights to lane-dense shapes ONCE (hoisted out of the per-call path).

    Set matmul_dtype=jnp.bfloat16 on v5e to halve MXU passes / weight DMA;
    biases and accumulation remain float32.
    """
    f_in, hidden = w1.shape
    num_classes = w2.shape[1]
    f_pad = pl.cdiv(f_in, 128) * 128                       # 176 -> 256
    n_pad = pl.cdiv(num_classes, 128) * 128                # 10  -> 128

    w1p = jnp.zeros((f_pad, hidden), matmul_dtype).at[:f_in, :].set(
        w1.astype(matmul_dtype))
    w2p = jnp.zeros((hidden, n_pad), matmul_dtype).at[:, :num_classes].set(
        w2.astype(matmul_dtype))
    b1p = b1.reshape(1, hidden).astype(jnp.float32)
    b2p = jnp.zeros((1, n_pad), jnp.float32).at[:, :num_classes].set(
        b2.reshape(1, num_classes).astype(jnp.float32))
    return {"w1": w1p, "b1": b1p, "w2": w2p, "b2": b2p,
            "num_classes": num_classes, "f_in": f_in}


# ---------------- forward wrapper ---------------------------------------------
def func_name_decoder_forward(features, ext_tokens, params, *, batch_tile=128,
                              topk=TOPK, num_external=NUM_EXTERNAL):
    """Returns the lane-dense padded output (B_pad, N_PAD).

    The consumer slices [:B, :num_classes] only if it needs the tight shape
    (kept out of this hot path per perf review).
    """
    b, t, d = features.shape
    _, num_calls, l = ext_tokens.shape
    w1p, b1p, w2p, b2p = params["w1"], params["b1"], params["w2"], params["b2"]
    f_pad, hidden = w1p.shape
    n_pad = w2p.shape[1]

    ext_flat = ext_tokens.reshape(b, num_calls * l)        # (B, NC*L)

    if b <= batch_tile:
        # Single tile, no batch-padding ops (block shape == full array dims).
        bt, b_pad = b, b
        feats, toks = features, ext_flat
    else:
        # Tile the batch; grid axis marked "parallel" (shards across TCs on v7x).
        bt = batch_tile
        b_pad = pl.cdiv(b, bt) * bt
        feats = jnp.pad(features, ((0, b_pad - b), (0, 0), (0, 0)))
        toks = jnp.pad(ext_flat, ((0, b_pad - b), (0, 0)))

    out_pad = pl.pallas_call(
        functools.partial(fused_kernel, topk=topk, num_external=num_external),
        out_shape=jax.ShapeDtypeStruct((b_pad, n_pad), jnp.float32),
        grid=(b_pad // bt,),
        in_specs=[
            pl.BlockSpec((bt, t, d), lambda i: (i, 0, 0)),
            pl.BlockSpec((bt, num_calls * l), lambda i: (i, 0)),
            pl.BlockSpec((f_pad, hidden), lambda i: (0, 0)),
            pl.BlockSpec((1, hidden), lambda i: (0, 0)),
            pl.BlockSpec((hidden, n_pad), lambda i: (0, 0)),
            pl.BlockSpec((1, n_pad), lambda i: (0, 0)),
        ],
        out_specs=pl.BlockSpec((bt, n_pad), lambda i: (i, 0)),
        scratch_shapes=[pltpu.VMEM((bt, f_pad), jnp.float32)],
        compiler_params=pltpu.CompilerParams(
            dimension_semantics=("parallel",)),
    )(feats, toks, w1p, b1p, w2p, b2p)

    return out_pad


# ---------------- pure-JAX reference (for correctness check) -----------------
def reference_forward(features, ext_tokens, w1, b1, w2, b2):
    x_mean = jnp.mean(features, axis=1)                       # (B, D)
    x_cls = features[:, 0, :]                                 # (B, D)
    x_topk = -jnp.sort(-features, axis=1)[:, :TOPK, :]        # (B, K, D) desc
    x_topk_flat = x_topk.reshape(features.shape[0], -1)       # (B, K*D)
    counts = jnp.zeros((features.shape[0], NUM_EXTERNAL), jnp.float32)
    for c in range(NUM_CALLS):
        oh = jax.nn.one_hot(ext_tokens[:, c, :], NUM_EXTERNAL + 4,
                            dtype=jnp.float32)
        counts = counts + oh.sum(axis=1)[:, 4:]
    x = jnp.concatenate([x_mean, x_cls, x_topk_flat, counts], axis=1)
    h = jnp.tanh(x @ w1 + b1)                                 # dropout = identity
    return h @ w2 + b2


# ---------------- main --------------------------------------------------------
if __name__ == "__main__":
    key = jax.random.PRNGKey(0)
    k_feat, k_tok, k_w1, k_b1, k_w2, k_b2 = jax.random.split(key, 6)

    features = jax.random.normal(k_feat, (B, T, D), dtype=jnp.float32)
    ext_tokens = jax.random.randint(
        k_tok, (B, NUM_CALLS, L), minval=0, maxval=NUM_EXTERNAL + 4,
        dtype=jnp.int32)

    # Deterministic synthetic parameters (stored as (in, out)).
    w1 = jax.random.normal(k_w1, (F_IN, HIDDEN), dtype=jnp.float32) * 0.05
    b1 = jax.random.normal(k_b1, (1, HIDDEN), dtype=jnp.float32) * 0.01
    w2 = jax.random.normal(k_w2, (HIDDEN, NUM_CLASSES), dtype=jnp.float32) * 0.05
    b2 = jax.random.normal(k_b2, (1, NUM_CLASSES), dtype=jnp.float32) * 0.01

    # One-time parameter prep (padding hoisted out of the forward path).
    params = prepare_params(w1, b1, w2, b2)
    params = jax.tree_util.tree_map(
        lambda x: jax.block_until_ready(x) if isinstance(x, jax.Array) else x,
        params)

    out_pad = func_name_decoder_forward(features, ext_tokens, params)
    out_pad = jax.block_until_ready(out_pad)

    # Consumer-side slice to the tight logits shape (only the demo needs it).
    out = out_pad[:B, :NUM_CLASSES]

    ref = reference_forward(features, ext_tokens, w1, b1, w2, b2)
    ref = jax.block_until_ready(ref)

    assert out.shape == (B, NUM_CLASSES), out.shape
    assert jnp.allclose(out, ref, rtol=1e-4, atol=1e-4), (
        float(jnp.max(jnp.abs(out - ref))))
    print("KERNEL_OK")
</pallas_src>

<mosaic_0001>
module attributes {stable_mosaic.version = 11 : i64} {
  func.func @fused_kernel(%arg0: i32, %arg1: memref<2x8x32xf32, #tpu.memory_space<vmem>>, %arg2: memref<2x12xi32, #tpu.memory_space<vmem>>, %arg3: memref<256x160xf32, #tpu.memory_space<vmem>>, %arg4: memref<1x160xf32, #tpu.memory_space<vmem>>, %arg5: memref<160x128xf32, #tpu.memory_space<vmem>>, %arg6: memref<1x128xf32, #tpu.memory_space<vmem>>, %arg7: memref<2x128xf32, #tpu.memory_space<vmem>>, %arg8: memref<2x256xf32, #tpu.memory_space<vmem>>) attributes {dimension_semantics = [#tpu.dimension_semantics<parallel>], iteration_bounds = array<i64: 1>, scalar_prefetch = 0 : i64, scratch_operands = 1 : i64, tpu.core_type = #tpu.core_type<tc>, window_params = [{transform_indices = @transform_0, window_bounds = array<i64: 2, 8, 32>}, {transform_indices = @transform_1, window_bounds = array<i64: 2, 12>}, {pipeline_mode = #tpu.pipeline_mode<synchronous>, transform_indices = @transform_2, window_bounds = array<i64: 256, 160>}, {pipeline_mode = #tpu.pipeline_mode<synchronous>, transform_indices = @transform_3, window_bounds = array<i64: 1, 160>}, {pipeline_mode = #tpu.pipeline_mode<synchronous>, transform_indices = @transform_4, window_bounds = array<i64: 160, 128>}, {pipeline_mode = #tpu.pipeline_mode<synchronous>, transform_indices = @transform_5, window_bounds = array<i64: 1, 128>}, {transform_indices = @transform_6, window_bounds = array<i64: 2, 128>}]} {
    %c0 = arith.constant 0 : index
    %c0_0 = arith.constant 0 : index
    %c0_1 = arith.constant 0 : index
    %0 = vector.load %arg1[%c0, %c0_0, %c0_1] : memref<2x8x32xf32, #tpu.memory_space<vmem>>, vector<2x8x32xf32>
    %cst = arith.constant 0.000000e+00 : f32
    %1 = vector.broadcast %cst : f32 to vector<2x256xf32>
    %c0_2 = arith.constant 0 : index
    %c0_3 = arith.constant 0 : index
    %2 = vector.load %arg8[%c0_2, %c0_3] : memref<2x256xf32, #tpu.memory_space<vmem>>, vector<2x256xf32>
    tpu.vector_store %arg8[%c0_2, %c0_3], %1 {strides = array<i32>} : memref<2x256xf32, #tpu.memory_space<vmem>>, vector<2x256xf32>,
    %cst_4 = arith.constant dense<0.000000e+00> : vector<2x32xf32>
    %3 = vector.multi_reduction <add>, %0, %cst_4 [1] : vector<2x8x32xf32> to vector<2x32xf32>
    %cst_5 = arith.constant 8.000000e+00 : f32
    %4 = vector.broadcast %cst_5 : f32 to vector<2x32xf32>
    %5 = arith.divf %3, %4 : vector<2x32xf32>
    %c0_6 = arith.constant 0 : index
    %c0_7 = arith.constant 0 : index
    %6 = vector.load %arg8[%c0_6, %c0_7] : memref<2x256xf32, #tpu.memory_space<vmem>>, vector<2x32xf32>
    tpu.vector_store %arg8[%c0_6, %c0_7], %5 {strides = array<i32>} : memref<2x256xf32, #tpu.memory_space<vmem>>, vector<2x32xf32>,
    %7 = vector.extract_strided_slice %0 {offsets = [0, 0, 0], sizes = [2, 1, 32], strides = [1, 1, 1]} : vector<2x8x32xf32> to vector<2x1x32xf32>
    %8 = vector.shape_cast %7 : vector<2x1x32xf32> to vector<2x32xf32>
    %c0_8 = arith.constant 0 : index
    %c32 = arith.constant 32 : index
    %9 = vector.load %arg8[%c0_8, %c32] : memref<2x256xf32, #tpu.memory_space<vmem>>, vector<2x32xf32>
    tpu.vector_store %arg8[%c0_8, %c32], %8 {strides = array<i32>} : memref<2x256xf32, #tpu.memory_space<vmem>>, vector<2x32xf32>,
    %10 = tpu.iota {dimensions = array<i32: 1>} : vector<2x8x32xi32>
    %c8_i32 = arith.constant 8 : i32
    %11 = vector.broadcast %c8_i32 : i32 to vector<2x8x32xi32>
    %cst_9 = arith.constant 0xFF800000 : f32
    %12 = vector.broadcast %cst_9 : f32 to vector<2x8x32xf32>
    %cst_10 = arith.constant dense<0xFF800000> : vector<2x32xf32>
    %13 = vector.multi_reduction <maximumf>, %0, %cst_10 [1] : vector<2x8x32xf32> to vector<2x32xf32>
    %14 = vector.shape_cast %13 : vector<2x32xf32> to vector<2x1x32xf32>
    %15 = vector.broadcast %14 : vector<2x1x32xf32> to vector<2x8x32xf32>
    %16 = arith.cmpf oeq, %0, %15 : vector<2x8x32xf32>
    %17 = arith.select %16, %10, %11 : vector<2x8x32xi1>, vector<2x8x32xi32>
    %cst_11 = arith.constant dense<2147483647> : vector<2x32xi32>
    %18 = vector.multi_reduction <minsi>, %17, %cst_11 [1] : vector<2x8x32xi32> to vector<2x32xi32>
    %19 = vector.shape_cast %18 : vector<2x32xi32> to vector<2x1x32xi32>
    %20 = vector.broadcast %19 : vector<2x1x32xi32> to vector<2x8x32xi32>
    %21 = arith.cmpi eq, %10, %20 : vector<2x8x32xi32>
    %22 = arith.select %21, %12, %0 : vector<2x8x32xi1>, vector<2x8x32xf32>
    %23 = vector.shape_cast %14 : vector<2x1x32xf32> to vector<2x32xf32>
    %c0_12 = arith.constant 0 : index
    %c64 = arith.constant 64 : index
    %24 = vector.load %arg8[%c0_12, %c64] : memref<2x256xf32, #tpu.memory_space<vmem>>, vector<2x32xf32>
    tpu.vector_store %arg8[%c0_12, %c64], %23 {strides = array<i32>} : memref<2x256xf32, #tpu.memory_space<vmem>>, vector<2x32xf32>,
    %cst_13 = arith.constant dense<0xFF800000> : vector<2x32xf32>
    %25 = vector.multi_reduction <maximumf>, %22, %cst_13 [1] : vector<2x8x32xf32> to vector<2x32xf32>
    %26 = vector.shape_cast %25 : vector<2x32xf32> to vector<2x1x32xf32>
    %27 = vector.broadcast %26 : vector<2x1x32xf32> to vector<2x8x32xf32>
    %28 = arith.cmpf oeq, %22, %27 : vector<2x8x32xf32>
    %29 = arith.select %28, %10, %11 : vector<2x8x32xi1>, vector<2x8x32xi32>
    %cst_14 = arith.constant dense<2147483647> : vector<2x32xi32>
    %30 = vector.multi_reduction <minsi>, %29, %cst_14 [1] : vector<2x8x32xi32> to vector<2x32xi32>
    %31 = vector.shape_cast %30 : vector<2x32xi32> to vector<2x1x32xi32>
    %32 = vector.broadcast %31 : vector<2x1x32xi32> to vector<2x8x32xi32>
    %33 = arith.cmpi eq, %10, %32 : vector<2x8x32xi32>
    %34 = arith.select %33, %12, %22 : vector<2x8x32xi1>, vector<2x8x32xf32>
    %35 = vector.shape_cast %26 : vector<2x1x32xf32> to vector<2x32xf32>
    %c0_15 = arith.constant 0 : index
    %c96 = arith.constant 96 : index
    %36 = vector.load %arg8[%c0_15, %c96] : memref<2x256xf32, #tpu.memory_space<vmem>>, vector<2x32xf32>
    tpu.vector_store %arg8[%c0_15, %c96], %35 {strides = array<i32>} : memref<2x256xf32, #tpu.memory_space<vmem>>, vector<2x32xf32>,
    %cst_16 = arith.constant dense<0xFF800000> : vector<2x32xf32>
    %37 = vector.multi_reduction <maximumf>, %34, %cst_16 [1] : vector<2x8x32xf32> to vector<2x32xf32>
    %38 = vector.shape_cast %37 : vector<2x32xf32> to vector<2x1x32xf32>
    %39 = vector.shape_cast %38 : vector<2x1x32xf32> to vector<2x32xf32>
    %c0_17 = arith.constant 0 : index
    %c128 = arith.constant 128 : index
    %40 = vector.load %arg8[%c0_17, %c128] : memref<2x256xf32, #tpu.memory_space<vmem>>, vector<2x32xf32>
    tpu.vector_store %arg8[%c0_17, %c128], %39 {strides = array<i32>} : memref<2x256xf32, #tpu.memory_space<vmem>>, vector<2x32xf32>,
    %c0_18 = arith.constant 0 : index
    %c0_19 = arith.constant 0 : index
    %41 = vector.load %arg2[%c0_18, %c0_19] : memref<2x12xi32, #tpu.memory_space<vmem>>, vector<2x12xi32>
    %42 = tpu.iota {dimensions = array<i32: 2>} : vector<1x1x16xi32>
    %c4_i32 = arith.constant 4 : i32
    %43 = vector.broadcast %c4_i32 : i32 to vector<1x1x16xi32>
    %44 = arith.addi %42, %43 : vector<1x1x16xi32>
    %45 = vector.shape_cast %41 : vector<2x12xi32> to vector<2x12x1xi32>
    %46 = vector.broadcast %45 : vector<2x12x1xi32> to vector<2x12x16xi32>
    %47 = vector.broadcast %44 : vector<1x1x16xi32> to vector<2x12x16xi32>
    %48 = arith.cmpi eq, %46, %47 : vector<2x12x16xi32>
    %49 = arith.extui %48 : vector<2x12x16xi1> to vector<2x12x16xi32>
    %50 = arith.sitofp %49 : vector<2x12x16xi32> to vector<2x12x16xf32>
    %cst_20 = arith.constant dense<0.000000e+00> : vector<2x16xf32>
    %51 = vector.multi_reduction <add>, %50, %cst_20 [1] : vector<2x12x16xf32> to vector<2x16xf32>
    %c0_21 = arith.constant 0 : index
    %c160 = arith.constant 160 : index
    %52 = vector.load %arg8[%c0_21, %c160] : memref<2x256xf32, #tpu.memory_space<vmem>>, vector<2x16xf32>
    tpu.vector_store %arg8[%c0_21, %c160], %51 {strides = array<i32>} : memref<2x256xf32, #tpu.memory_space<vmem>>, vector<2x16xf32>,
    %c0_22 = arith.constant 0 : index
    %c0_23 = arith.constant 0 : index
    %53 = vector.load %arg3[%c0_22, %c0_23] : memref<256x160xf32, #tpu.memory_space<vmem>>, vector<256x160xf32>
    %c0_24 = arith.constant 0 : index
    %c0_25 = arith.constant 0 : index
    %54 = vector.load %arg8[%c0_24, %c0_25] : memref<2x256xf32, #tpu.memory_space<vmem>>, vector<2x256xf32>
    %cst_26 = arith.constant dense<0.000000e+00> : vector<2x160xf32>
    %55 = tpu.matmul %54, %53, %cst_26 {dimension_numbers = #tpu.dot_dimension_numbers<[1], [0], [0], [1], [0, 0, 1, 1], [], []>} : vector<2x256xf32>, vector<256x160xf32>, vector<2x160xf32> -> vector<2x160xf32>
    %c0_27 = arith.constant 0 : index
    %c0_28 = arith.constant 0 : index
    %56 = vector.load %arg4[%c0_27, %c0_28] : memref<1x160xf32, #tpu.memory_space<vmem>>, vector<1x160xf32>
    %57 = vector.broadcast %56 : vector<1x160xf32> to vector<2x160xf32>
    %58 = arith.addf %55, %57 : vector<2x160xf32>
    %59 = math.tanh %58 : vector<2x160xf32>
    %c0_29 = arith.constant 0 : index
    %c0_30 = arith.constant 0 : index
    %60 = vector.load %arg5[%c0_29, %c0_30] : memref<160x128xf32, #tpu.memory_space<vmem>>, vector<160x128xf32>
    %cst_31 = arith.constant dense<0.000000e+00> : vector<2x128xf32>
    %61 = tpu.matmul %59, %60, %cst_31 {dimension_numbers = #tpu.dot_dimension_numbers<[1], [0], [0], [1], [0, 0, 1, 1], [], []>} : vector<2x160xf32>, vector<160x128xf32>, vector<2x128xf32> -> vector<2x128xf32>
    %c0_32 = arith.constant 0 : index
    %c0_33 = arith.constant 0 : index
    %62 = vector.load %arg6[%c0_32, %c0_33] : memref<1x128xf32, #tpu.memory_space<vmem>>, vector<1x128xf32>
    %63 = vector.broadcast %62 : vector<1x128xf32> to vector<2x128xf32>
    %64 = arith.addf %61, %63 : vector<2x128xf32>
    %c0_34 = arith.constant 0 : index
    %c0_35 = arith.constant 0 : index
    %65 = vector.load %arg7[%c0_34, %c0_35] : memref<2x128xf32, #tpu.memory_space<vmem>>, vector<2x128xf32>
    tpu.vector_store %arg7[%c0_34, %c0_35], %64 {strides = array<i32>} : memref<2x128xf32, #tpu.memory_space<vmem>>, vector<2x128xf32>,
    return
  }
  func.func @transform_0(%arg0: i32) -> (i32, i32, i32) {
    %c0_i32 = arith.constant 0 : i32
    %c0_i32_0 = arith.constant 0 : i32
    %c0_i32_1 = arith.constant 0 : i32
    return %arg0, %c0_i32, %c0_i32_0 : i32, i32, i32
  }
  func.func @transform_1(%arg0: i32) -> (i32, i32) {
    %c0_i32 = arith.constant 0 : i32
    %c0_i32_0 = arith.constant 0 : i32
    return %arg0, %c0_i32 : i32, i32
  }
  func.func @transform_2(%arg0: i32) -> (i32, i32) {
    %c0_i32 = arith.constant 0 : i32
    %c0_i32_0 = arith.constant 0 : i32
    %c0_i32_1 = arith.constant 0 : i32
    return %c0_i32, %c0_i32_0 : i32, i32
  }
  func.func @transform_3(%arg0: i32) -> (i32, i32) {
    %c0_i32 = arith.constant 0 : i32
    %c0_i32_0 = arith.constant 0 : i32
    %c0_i32_1 = arith.constant 0 : i32
    return %c0_i32, %c0_i32_0 : i32, i32
  }
  func.func @transform_4(%arg0: i32) -> (i32, i32) {
    %c0_i32 = arith.constant 0 : i32
    %c0_i32_0 = arith.constant 0 : i32
    %c0_i32_1 = arith.constant 0 : i32
    return %c0_i32, %c0_i32_0 : i32, i32
  }
  func.func @transform_5(%arg0: i32) -> (i32, i32) {
    %c0_i32 = arith.constant 0 : i32
    %c0_i32_0 = arith.constant 0 : i32
    %c0_i32_1 = arith.constant 0 : i32
    return %c0_i32, %c0_i32_0 : i32, i32
  }
  func.func @transform_6(%arg0: i32) -> (i32, i32) {
    %c0_i32 = arith.constant 0 : i32
    %c0_i32_0 = arith.constant 0 : i32
    return %arg0, %c0_i32 : i32, i32
  }
}

</mosaic_0001>

<bundles_post_ra>
// kernel: tpu_custom_call.1
= control target key start
LH: loop header
LB: loop body
LE: loop exit
PB: predicated region body
PF: predicated region fallthrough
CT: control target
= control target key end

     0   :  { %v50_v0 = vlaneseq  ;;  %v687_v2 = vmov 0.0   ;;  %vm27_vm0 = vcmask 261120   ;;  %s1125_s0 = inlined_call_operand.vmem [shape: f32[2,8,32], index: 0, kind: input, shape index: {}]   ;;  %s1126_s1 = inlined_call_operand.vmem [shape: s32[2,12], index: 1, kind: input, shape index: {}]   ;;  %s1127_s2 = inlined_call_operand.vmem [shape: f32[256,160], index: 2, kind: input, shape index: {}]   ;;  %s1128_s3 = inlined_call_operand.vmem [shape: f32[1,160], index: 3, kind: input, shape index: {}]   ;;  %s1129_s4 = inlined_call_operand.vmem [shape: f32[160,128], index: 4, kind: input, shape index: {}]   ;;  %s1130_s5 = inlined_call_operand.vmem [shape: f32[1,128], index: 5, kind: input, shape index: {}]   ;;  %s1131_s6 = inlined_call_operand.hbm [shape: f32[2,128], index: 6, kind: output, shape index: {}]  }
   0x1   :  { %v731_v1 = vld [vmem:[%s1125_s0] sm:$0xff]  ;;  %26 = vst [vmem:[#allocation2] sm:$0xf] %v687_v2  ;;  %v737_v3 = vld [vmem:[%s1125_s0 + $0x8] sm:$0xff]  ;;  %563 = vmatprep.subr.mxu1 %v687_v2 }
   0x2   :  { %11 = vsyncpa [#allocation4], 0  ;;  %v741_v4 = vshrl.u32 %v50_v0, 7  ;;  %v107_v5 = vsel %vm27_vm0, %v731_v1, -inf  ;;  %v114_v6 = vsel %vm27_vm0, %v737_v3, -inf  ;;  %vm66_vm1 = vcmask 1041409  }
   0x3   :  { %v286_v7 = vld [vmem:[%s1126_s1] sm:$0x3]  ;;  %v108_v8 = vrot.slane %v107_v5, 4  ;;  %v115_v9 = vrot.slane %v114_v6, 4  ;;  %v688_v12 = vmov 1983009808  }
   0x4   :  { %v303_v10 = vsub.s32 1, %v741_v4  ;;  %v292_v11 = vsub.s32 0, %v741_v4  ;;  %v48_v13 = vunpack.c.l.s4 %v688_v12  ;;  %vm68_vm2 = vcmask 1043459   ;;  %s689_s0 = smov 32   ;;  %v403_v52 = vld [vmem:[%s1127_s2 + $0xf8] sm:$0xff]  ;;  %v402_v53 = vld [vmem:[%s1127_s2 + $0xf0] sm:$0xff] }
   0x5   :  { %v109_v14 = vmax.f32 %v107_v5, %v108_v8  ;;  %v116_v15 = vmax.f32 %v114_v6, %v115_v9  ;;  %vm70_vm4 = vcmask 1045509   ;;  %vm72_vm5 = vcmask 1047559   ;;  %v401_v54 = vld [vmem:[%s1127_s2 + $0xe8] sm:$0xff]  ;;  %s690_s8 = smov 64   ;;  %460 = vmatprep.subr.mxu0 %v403_v52  ;;  %v400_v57 = vld [vmem:[%s1127_s2 + $0xe0] sm:$0xff]  ;;  %v399_v60 = vld [vmem:[%s1127_s2 + $0xd8] sm:$0xff] }
   0x6   :  { %v304_v16 = vrot.slane %v286_v7, %v303_v10  ;;  %v293_v17 = vrot.slane %v286_v7, %v292_v11  ;;  %v49_v18 = vunpack.c.0.s8 %v48_v13  ;;  %v35_v55 = vsel %vm27_vm0, %v737_v3, 0.0  ;;  %461 = vmatpush1.msra.mxu0 %v402_v53  ;;  %v398_v63 = vld [vmem:[%s1127_s2 + $0xd0] sm:$0xff]  ;;  %v397_v8 = vld [vmem:[%s1127_s2 + $0xc8] sm:$0xff]  ;;  %v396_v12 = vld [vmem:[%s1127_s2 + $0xc0] sm:$0xff]  ;;  %s691_s15 = smov 96  }
   0x7   :  { %v110_v19 = vrot.slane %v109_v14, 2  ;;  %v117_v20 = vrot.slane %v116_v15, 2  ;;  %v36_v58 = vrot.slane %v35_v55, 4  ;;  %v28_v61 = vsel %vm27_vm0, %v731_v1, 0.0  ;;  %462 = vmatprep.subr.mxu0 %v401_v54  ;;  %v383_v52 = vld [vmem:[%s1127_s2 + $0x58] sm:$0xff] }
   0x8   :  { %306 = vbcast.lane.b32.xlu0 %v304_v16, 256  ;;  %295 = vbcast.lane.b32.xlu1 %v293_v17, 256  ;;  %v757_v21 = vsub.s32 %v49_v18, %v741_v4  ;;  %v29_v6 = vrot.slane %v28_v61, 4  ;;  %v394_v18 = vld [vmem:[%s1127_s2 + $0xb0] sm:$0xff]  ;;  %vm75_vm15 = vcmask 254976  }
   0x9   :  { %v111_v22 = vmax.f32 %v109_v14, %v110_v19  ;;  %v118_v23 = vmax.f32 %v116_v15, %v117_v20  ;;  %v37_v5 = vadd.f32 %v36_v58, %v35_v55  ;;  %463 = vmatpush1.msra.mxu0 %v400_v57  ;;  %v395_v15 = vld [vmem:[%s1127_s2 + $0xb8] sm:$0xff]  ;;  %v382_v55 = vld [vmem:[%s1127_s2 + $0x50] sm:$0xff]  ;;  %v381_v57 = vld [vmem:[%s1127_s2 + $0x48] sm:$0xff] }
   0xa   :  { %v92_v24 = vrot.slane %v737_v3, %v757_v21  ;;  %v85_v27 = vrot.slane %v731_v1, %v757_v21  ;;  %464 = vmatprep.subr.mxu0 %v399_v60  ;;  %v30_v14 = vadd.f32 %v29_v6, %v28_v61  ;;  %v380_v61 = vld [vmem:[%s1127_s2 + $0x40] sm:$0xff] }
   0xb   :  { %v112_v25 = vrot.slane %v111_v22, 1  ;;  %v119_v26 = vrot.slane %v118_v23, 1  ;;  %v38_v13 = vrot.slane %v37_v5, 2  ;;  %465 = vmatpush1.msra.mxu0 %v398_v63 }
   0xc   :  { %310 = vbcast.lane.b32.xlu0 %v304_v16, 264  ;;  %299 = vbcast.lane.b32.xlu1 %v293_v17, 264  ;;  %v95_v28 = vrot.slane %v92_v24, 7  ;;  %v31_v20 = vrot.slane %v30_v14, 2 }
   0xd   :  { %v113_v29 = vmax.f32 %v111_v22, %v112_v25  ;;  %v120_v30 = vmax.f32 %v118_v23, %v119_v26  ;;  %466 = vmatprep.subr.mxu0 %v397_v8  ;;  %v39_v19 = vadd.f32 %v38_v13, %v37_v5  ;;  %v393_v23 = vld [vmem:[%s1127_s2 + $0xa8] sm:$0xff]  ;;  %v392_v25 = vld [vmem:[%s1127_s2 + $0xa0] sm:$0xff]  ;;  %v379_v5 = vld [vmem:[%s1127_s2 + $0x38] sm:$0xff] }
   0xe   :  { %v96_v31 = vsel %vm66_vm1, %v95_v28, %v85_v27  ;;  %467 = vmatpush1.msra.mxu0 %v396_v12  ;;  %v32_v27 = vadd.f32 %v31_v20, %v30_v14  ;;  %v378_v12 = vld [vmem:[%s1127_s2 + $0x30] sm:$0xff] }
   0xf   :  { %vm122_vm3 = vcmp.eq.f32.partialorder %v737_v3, %v120_v30  ;;  %v157_v32 = vrot.slane %v113_v29, %v757_v21  ;;  %v97_v33 = vsel %vm68_vm2, %v95_v28, %v96_v31  ;;  %v164_v37 = vrot.slane %v120_v30, %v757_v21  ;;  %468 = vmatprep.subr.mxu0 %v395_v15  ;;  %v377_v15 = vld [vmem:[%s1127_s2 + $0x28] sm:$0xff] }
  0x10   :  { %v124_v34 = vsel %vm122_vm3, %v741_v4, 8  ;;  %v98_v35 = vsel %vm70_vm4, %v95_v28, %v97_v33  ;;  %vm121_vm6 = vcmp.eq.f32.partialorder %v731_v1, %v113_v29  ;;  %v40_v26 = vrot.slane %v39_v19, 1  ;;  %469 = vmatpush1.msra.mxu0 %v394_v18  ;;  %v391_v29 = vld [vmem:[%s1127_s2 + $0x98] sm:$0xff] }
  0x11   :  { %v135_v36 = vsel %vm27_vm0, %v124_v34, 2147483647  ;;  %v99_v38 = vsel %vm72_vm5, %v95_v28, %v98_v35  ;;  %v123_v40 = vsel %vm121_vm6, %v741_v4, 8  ;;  %v167_v41 = vrot.slane %v164_v37, 7  ;;  %470 = vmatprep.subr.mxu0 %v393_v23  ;;  %v389_v34 = vld [vmem:[%s1127_s2 + $0x88] sm:$0xff]  ;;  %v388_v37 = vld [vmem:[%s1127_s2 + $0x80] sm:$0xff] }
  0x12   :  { %v136_v39 = vrot.slane %v135_v36, 4  ;;  %100 = vrot.lane.b32.xlu0 %v99_v38, %s689_s0  ;;  %v125_v42 = vsel %vm27_vm0, %v123_v40, 2147483647  ;;  %v33_v33 = vrot.slane %v32_v27, 1  ;;  %471 = vmatpush1.msra.mxu0 %v392_v25  ;;  %v387_v40 = vld [vmem:[%s1127_s2 + $0x78] sm:$0xff] }
  0x13   :  { %v126_v43 = vrot.slane %v125_v42, 4  ;;  %v168_v45 = vsel %vm66_vm1, %v167_v41, %v157_v32  ;;  %v41_v32 = vadd.f32 %v40_v26, %v39_v19  ;;  %472 = vmatprep.subr.mxu0 %v391_v29  ;;  %v376_v19 = vld [vmem:[%s1127_s2 + $0x20] sm:$0xff]  ;;  %v375_v23 = vld [vmem:[%s1127_s2 + $0x18] sm:$0xff]  ;;  %v374_v26 = vld [vmem:[%s1127_s2 + $0x10] sm:$0xff] }
  0x14   :  { %vm137_vm7 = vcmp.lt.s32.totalorder %v135_v36, %v136_v39  ;;  %v169_v47 = vsel %vm68_vm2, %v167_v41, %v168_v45  ;;  %v373_v29 = vld [vmem:[%s1127_s2 + $0x8] sm:$0xff] }
  0x15   :  { %v138_v44 = vsel %vm137_vm7, %v135_v36, %v136_v39  ;;  %vm127_vm8 = vcmp.lt.s32.totalorder %v125_v42, %v126_v43  ;;  %v170_v48 = vsel %vm70_vm4, %v167_v41, %v169_v47  ;;  %v44_v38 = vmul.f32 0.125, %v41_v32  ;;  %v435_v32 = vld [vmem:[%s1127_s2 + $0x1f8] sm:$0xff] }
  0x16   :  { %v139_v46 = vrot.slane %v138_v44, 2  ;;  %v128_v49 = vsel %vm127_vm8, %v125_v42, %v126_v43  ;;  %v171_v50 = vsel %vm72_vm5, %v167_v41, %v170_v48  ;;  %v34_v39 = vadd.f32 %v33_v33, %v32_v27  ;;  %v386_v43 = vld [vmem:[%s1127_s2 + $0x70] sm:$0xff] }
  0x17   :  { %v129_v51 = vrot.slane %v128_v49, 2  ;;  %172 = vrot.lane.b32.xlu1 %v171_v50, %s690_s8 }
  0x18   :  { %vm140_vm9 = vcmp.lt.s32.totalorder %v138_v44, %v139_v46  ;;  %v43_v45 = vmul.f32 0.125, %v34_v39 }
  0x19   :  { %v141_v56 = vsel %vm140_vm9, %v138_v44, %v139_v46  ;;  %vm130_vm10 = vcmp.lt.s32.totalorder %v128_v49, %v129_v51  ;;  %v60_v44 = vrot.slane %v44_v38, %v757_v21  ;;  %v385_v46 = vld [vmem:[%s1127_s2 + $0x68] sm:$0xff]  ;;  %v432_v38 = vld [vmem:[%s1127_s2 + $0x1e0] sm:$0xff] }
  0x1a   :  { %v142_v59 = vrot.slane %v141_v56, 1  ;;  %v131_v62 = vsel %vm130_vm10, %v128_v49, %v129_v51  ;;  %v384_v49 = vld [vmem:[%s1127_s2 + $0x60] sm:$0xff]  ;;  %v53_v51 = vrot.slane %v43_v45, %v757_v21 }
  0x1b   :  { %v132_v7 = vrot.slane %v131_v62, 1  ;;  %v65_v50 = vrot.slane %v60_v44, 7 }
  0x1c   :  { %vm143_vm11 = vcmp.lt.s32.totalorder %v141_v56, %v142_v59 }
  0x1d   :  { %v144_v9 = vsel %vm143_vm11, %v141_v56, %v142_v59  ;;  %vm133_vm12 = vcmp.lt.s32.totalorder %v131_v62, %v132_v7  ;;  %v67_v56 = vsel %vm66_vm1, %v65_v50, %v53_v51  ;;  %v422_v51 = vld [vmem:[%s1127_s2 + $0x190] sm:$0xff] }
  0x1e   :  { %vm146_vm13 = vcmp.eq.s32.totalorder %v741_v4, %v144_v9  ;;  %v134_v16 = vsel %vm133_vm12, %v131_v62, %v132_v7  ;;  %v69_v58 = vsel %vm68_vm2, %v65_v50, %v67_v56  ;;  %v417_v56 = vld [vmem:[%s1127_s2 + $0x168] sm:$0xff] }
  0x1f   :  { %v813_v17 = vsel %vm146_vm13, -inf, %v737_v3  ;;  %vm145_vm14 = vcmp.eq.s32.totalorder %v741_v4, %v134_v16  ;;  %v71_v62 = vsel %vm70_vm4, %v65_v50, %v69_v58  ;;  %v415_v58 = vld [vmem:[%s1127_s2 + $0x158] sm:$0xff] }
  0x20   :  { %v184_v22 = vsel %vm27_vm0, %v813_v17, -inf  ;;  %v825_v3 = vsel %vm145_vm14, -inf, %v731_v1  ;;  %v390_v1 = vld [vmem:[%s1127_s2 + $0x90] sm:$0xff]  ;;  %v73_v6 = vsel %vm72_vm5, %v65_v50, %v71_v62  ;;  %v424_v50 = vld [vmem:[%s1127_s2 + $0x1a0] sm:$0xff] }
  0x21   :  { %v185_v24 = vrot.slane %v184_v22, 4  ;;  %v177_v28 = vsel %vm27_vm0, %v825_v3, -inf  ;;  %473 = vmatpush1.msra.mxu0 %v390_v1  ;;  %76 = vst.msk [vmem:[#allocation2] sm:$0x3] %vm75_vm15, %v73_v6 }
  0x22   :  { %v178_v30 = vrot.slane %v177_v28, 4  ;;  %474 = vmatprep.subr.mxu0 %v389_v34  ;;  %v434_v34 = vld [vmem:[%s1127_s2 + $0x1f0] sm:$0xff] }
  0x23   :  { %v186_v31 = vmax.f32 %v184_v22, %v185_v24  ;;  %475 = vmatpush1.msra.mxu0 %v388_v37 }
  0x24   :  { %v179_v35 = vmax.f32 %v177_v28, %v178_v30  ;;  %476 = vmatprep.subr.mxu0 %v387_v40  ;;  %v431_v40 = vld [vmem:[%s1127_s2 + $0x1d8] sm:$0xff] }
  0x25   :  { %v187_v36 = vrot.slane %v186_v31, 2  ;;  %477 = vmatpush1.msra.mxu0 %v386_v43  ;;  %v429_v43 = vld [vmem:[%s1127_s2 + $0x1c8] sm:$0xff] }
  0x26   :  { %v180_v41 = vrot.slane %v179_v35, 2  ;;  %478 = vmatprep.subr.mxu0 %v385_v46  ;;  %v428_v46 = vld [vmem:[%s1127_s2 + $0x1c0] sm:$0xff] }
  0x27   :  { %v188_v42 = vmax.f32 %v186_v31, %v187_v36  ;;  %479 = vmatpush1.msra.mxu0 %v384_v49  ;;  %v372_v31 = vld [vmem:[%s1127_s2] sm:$0xff]  ;;  %v433_v36 = vld [vmem:[%s1127_s2 + $0x1e8] sm:$0xff]  ;;  %v426_v49 = vld [vmem:[%s1127_s2 + $0x1b0] sm:$0xff] }
  0x28   :  { %v181_v47 = vmax.f32 %v179_v35, %v180_v41  ;;  %480 = vmatprep.subr.mxu0 %v383_v52  ;;  %v421_v52 = vld [vmem:[%s1127_s2 + $0x188] sm:$0xff] }
  0x29   :  { %v189_v48 = vrot.slane %v188_v42, 1  ;;  %481 = vmatpush1.msra.mxu0 %v382_v55  ;;  %v418_v55 = vld [vmem:[%s1127_s2 + $0x170] sm:$0xff] }
  0x2a   :  { %v182_v53 = vrot.slane %v181_v47, 1  ;;  %482 = vmatprep.subr.mxu0 %v381_v57  ;;  %v416_v57 = vld [vmem:[%s1127_s2 + $0x160] sm:$0xff] }
  0x2b   :  { %v190_v54 = vmax.f32 %v188_v42, %v189_v48  ;;  %483 = vmatpush1.msra.mxu0 %v380_v61  ;;  %v430_v42 = vld [vmem:[%s1127_s2 + $0x1d0] sm:$0xff] }
  0x2c   :  { %v183_v59 = vmax.f32 %v181_v47, %v182_v53  ;;  %484 = vmatprep.subr.mxu0 %v379_v5  ;;  %v427_v47 = vld [vmem:[%s1127_s2 + $0x1b8] sm:$0xff]  ;;  %v420_v53 = vld [vmem:[%s1127_s2 + $0x180] sm:$0xff]  ;;  %v288_v5 = vand.u32 127, %v50_v0 }
  0x2d   :  { %vm192_vm3 = vcmp.eq.f32.partialorder %v813_v17, %v190_v54  ;;  %v234_v60 = vrot.slane %v190_v54, %v757_v21  ;;  %485 = vmatpush1.msra.mxu0 %v378_v12  ;;  %v419_v54 = vld [vmem:[%s1127_s2 + $0x178] sm:$0xff] }
  0x2e   :  { %v194_v63 = vsel %vm192_vm3, %v741_v4, 8  ;;  %vm191_vm6 = vcmp.eq.f32.partialorder %v825_v3, %v183_v59  ;;  %v227_v8 = vrot.slane %v183_v59, %v757_v21  ;;  %486 = vmatprep.subr.mxu0 %v377_v15 }
  0x2f   :  { %v205_v7 = vsel %vm27_vm0, %v194_v63, 2147483647  ;;  %v237_v9 = vrot.slane %v234_v60, 7  ;;  %v193_v13 = vsel %vm191_vm6, %v741_v4, 8  ;;  %487 = vmatpush1.msra.mxu0 %v376_v19 }
  0x30   :  { %v206_v14 = vrot.slane %v205_v7, 4  ;;  %v195_v16 = vsel %vm27_vm0, %v193_v13, 2147483647  ;;  %488 = vmatprep.subr.mxu0 %v375_v23 }
  0x31   :  { %v238_v18 = vsel %vm66_vm1, %v237_v9, %v227_v8  ;;  %v196_v20 = vrot.slane %v195_v16, 4  ;;  %489 = vmatpush1.msra.mxu0 %v374_v26 }
  0x32   :  { %vm207_vm7 = vcmp.lt.s32.totalorder %v205_v7, %v206_v14  ;;  %v239_v22 = vsel %vm68_vm2, %v237_v9, %v238_v18  ;;  %490 = vmatprep.subr.mxu0 %v373_v29 }
  0x33   :  { %v208_v24 = vsel %vm207_vm7, %v205_v7, %v206_v14  ;;  %v240_v25 = vsel %vm70_vm4, %v237_v9, %v239_v22  ;;  %vm197_vm8 = vcmp.lt.s32.totalorder %v195_v16, %v196_v20  ;;  %491 = vmatpush1.msra.mxu0 %v372_v31  ;;  %vm324_vm7 = vcmask 130048  }
  0x34   :  { %v209_v27 = vrot.slane %v208_v24, 2  ;;  %v241_v28 = vsel %vm72_vm5, %v237_v9, %v240_v25  ;;  %v198_v30 = vsel %vm197_vm8, %v195_v16, %v196_v20  ;;  %492 = vmatprep.subr.mxu0 %v435_v32  ;;  %v289_v9 = vadd.s32 4, %v288_v5  ;;  %v404_v5 = vld [vmem:[%s1127_s2 + $0x100] sm:$0xff] }
  0x35   :  { %242 = vrot.lane.b32.xlu0 %v241_v28, %s691_s15  ;;  %v199_v1 = vrot.slane %v198_v30, 2  ;;  %493 = vmatpush2.msra.mxu0 %v434_v34  ;;  %vm326_vm8 = vcmask 125952  }
  0x36   :  { %vm210_vm9 = vcmp.lt.s32.totalorder %v208_v24, %v209_v27  ;;  %494 = vmatprep.subr.mxu0 %v433_v36 }
  0x37   :  { %v211_v33 = vsel %vm210_vm9, %v208_v24, %v209_v27  ;;  %vm200_vm10 = vcmp.lt.s32.totalorder %v198_v30, %v199_v1  ;;  %495 = vmatpush2.msra.mxu0 %v432_v38 }
  0x38   :  { %v212_v35 = vrot.slane %v211_v33, 1  ;;  %v201_v37 = vsel %vm200_vm10, %v198_v30, %v199_v1  ;;  %496 = vmatprep.subr.mxu0 %v431_v40 }
  0x39   :  { %v202_v39 = vrot.slane %v201_v37, 1  ;;  %497 = vmatpush2.msra.mxu0 %v430_v42 }
  0x3a   :  { %vm213_vm11 = vcmp.lt.s32.totalorder %v211_v33, %v212_v35  ;;  %498 = vmatprep.subr.mxu0 %v429_v43 }
  0x3b   :  { %v214_v41 = vsel %vm213_vm11, %v211_v33, %v212_v35  ;;  %vm203_vm12 = vcmp.lt.s32.totalorder %v201_v37, %v202_v39  ;;  %499 = vmatpush2.msra.mxu0 %v428_v46  ;;  %vm103_vm11 = vcmask 517376  }
  0x3c   :  { %vm216_vm13 = vcmp.eq.s32.totalorder %v741_v4, %v214_v41  ;;  %v204_v44 = vsel %vm203_vm12, %v201_v37, %v202_v39  ;;  %500 = vmatprep.subr.mxu0 %v427_v47  ;;  %vm175_vm12 = vcmask 779776  }
  0x3d   :  { %v218_v45 = vsel %vm216_vm13, -inf, %v813_v17  ;;  %vm215_vm14 = vcmp.eq.s32.totalorder %v741_v4, %v204_v44  ;;  %v425_v17 = vld [vmem:[%s1127_s2 + $0x1a8] sm:$0xff]  ;;  %501 = vmatpush2.msra.mxu0 %v426_v49 }
  0x3e   :  { %v217_v48 = vsel %vm215_vm14, -inf, %v825_v3  ;;  %v423_v3 = vld [vmem:[%s1127_s2 + $0x198] sm:$0xff]  ;;  %502 = vmatprep.subr.mxu0 %v425_v17  ;;  %v254_v59 = vsel %vm27_vm0, %v218_v45, -inf  ;;  %v413_v17 = vld [vmem:[%s1127_s2 + $0x148] sm:$0xff] }
  0x3f   :  { %503 = vmatpush2.msra.mxu0 %v424_v50  ;;  %v255_v60 = vrot.slane %v254_v59, 4  ;;  %v247_v6 = vsel %vm27_vm0, %v217_v48, -inf  ;;  %v414_v48 = vld [vmem:[%s1127_s2 + $0x150] sm:$0xff]  ;;  %v412_v50 = vld [vmem:[%s1127_s2 + $0x140] sm:$0xff] }
  0x40   :  { %504 = vmatprep.subr.mxu0 %v423_v3  ;;  %v248_v7 = vrot.slane %v247_v6, 4  ;;  %v411_v3 = vld [vmem:[%s1127_s2 + $0x138] sm:$0xff] }
  0x41   :  { %505 = vmatpush2.msra.mxu0 %v422_v51  ;;  %v256_v61 = vmax.f32 %v254_v59, %v255_v60  ;;  %v406_v60 = vld [vmem:[%s1127_s2 + $0x110] sm:$0xff] }
  0x42   :  { %506 = vmatprep.subr.mxu0 %v421_v52  ;;  %v249_v15 = vmax.f32 %v247_v6, %v248_v7 }
  0x43   :  { %507 = vmatpush2.msra.mxu0 %v420_v53  ;;  %v257_v62 = vrot.slane %v256_v61, 2  ;;  %v410_v53 = vld [vmem:[%s1127_s2 + $0x130] sm:$0xff] }
  0x44   :  { %508 = vmatprep.subr.mxu0 %v419_v54  ;;  %v250_v16 = vrot.slane %v249_v15, 2  ;;  %v409_v54 = vld [vmem:[%s1127_s2 + $0x128] sm:$0xff] }
  0x45   :  { %509 = vmatpush2.msra.mxu0 %v418_v55  ;;  %v258_v63 = vmax.f32 %v256_v61, %v257_v62  ;;  %v405_v61 = vld [vmem:[%s1127_s2 + $0x108] sm:$0xff] }
  0x46   :  { %510 = vmatprep.subr.mxu0 %v417_v56  ;;  %v251_v23 = vmax.f32 %v249_v15, %v250_v16  ;;  %v544_v15 = vld [vmem:[%s1129_s4 + $0x58] sm:$0xff]  ;;  %v543_v16 = vld [vmem:[%s1129_s4 + $0x50] sm:$0xff] }
  0x47   :  { %511 = vmatpush2.msra.mxu0 %v416_v57  ;;  %v259_v8 = vrot.slane %v258_v63, 1  ;;  %v408_v57 = vld [vmem:[%s1127_s2 + $0x120] sm:$0xff] }
  0x48   :  { %512 = vmatprep.subr.mxu0 %v415_v58  ;;  %v252_v26 = vrot.slane %v251_v23, 1  ;;  %v407_v58 = vld [vmem:[%s1127_s2 + $0x118] sm:$0xff] }
  0x49   :  { %v260_v14 = vmax.f32 %v258_v63, %v259_v8  ;;  %513 = vmatpush2.msra.mxu0 %v414_v48 }
  0x4a   :  { %v253_v33 = vmax.f32 %v251_v23, %v252_v26  ;;  %514 = vmatprep.subr.mxu0 %v413_v17  ;;  %v538_v26 = vld [vmem:[%s1129_s4 + $0x28] sm:$0xff] }
  0x4b   :  { %v276_v22 = vrot.slane %v260_v14, %v757_v21  ;;  %515 = vmatpush2.msra.mxu0 %v412_v50  ;;  %v545_v14 = vld [vmem:[%s1129_s4 + $0x60] sm:$0xff] }
  0x4c   :  { %v269_v36 = vrot.slane %v253_v33, %v757_v21  ;;  %516 = vmatprep.subr.mxu0 %v411_v3  ;;  %v550_v33 = vld [vmem:[%s1129_s4 + $0x88] sm:$0xff] }
  0x4d   :  { %v279_v32 = vrot.slane %v276_v22, 7  ;;  %517 = vmatpush2.msra.mxu0 %v410_v53 }
  0x4e   :  { %518 = vmatprep.subr.mxu0 %v409_v54 }
  0x4f   :  { %v280_v40 = vsel %vm66_vm1, %v279_v32, %v269_v36  ;;  %519 = vmatpush2.msra.mxu0 %v408_v57 }
  0x50   :  { %v281_v41 = vsel %vm68_vm2, %v279_v32, %v280_v40  ;;  %520 = vmatprep.subr.mxu0 %v407_v58 }
  0x51   :  { %v282_v44 = vsel %vm70_vm4, %v279_v32, %v281_v41  ;;  %521 = vmatpush2.msra.mxu0 %v406_v60 }
  0x52   :  { %v283_v45 = vsel %vm72_vm5, %v279_v32, %v282_v44  ;;  %522 = vmatprep.subr.mxu0 %v405_v61  ;;  %v551_v32 = vld [vmem:[%s1129_s4 + $0x90] sm:$0xff] }
  0x53   :  { %285 = vst.msk [vmem:[#allocation2 + $0x2] sm:$0x3] %vm75_vm15, %v283_v45  ;;  %523 = vmatpush2.msra.mxu0 %v404_v5 }
  0x7a   :  { %v307_v12 = vpop.permute.xlu0 %306  ;;  %v296_v13 = vpop.permute.xlu1 %295 }
  0x7b   :  { %vm314_vm3 = vcmp.eq.s32.totalorder %v307_v12, %v289_v9  ;;  %vm312_vm6 = vcmp.eq.s32.totalorder %v296_v13, %v289_v9  ;;  %v546_v13 = vld [vmem:[%s1129_s4 + $0x68] sm:$0xff] }
  0x7c   :  { %v650_v18 = vsel %vm314_vm3, 1.0, %v687_v2  ;;  %v648_v19 = vsel %vm312_vm6, 1.0, %v687_v2 }
  0x7d   :  { %v335_v27 = vsel %vm324_vm7, %v650_v18, 0.0  ;;  %v325_v28 = vsel %vm324_vm7, %v648_v19, 0.0  ;;  %v542_v18 = vld [vmem:[%s1129_s4 + $0x48] sm:$0xff]  ;;  %v541_v19 = vld [vmem:[%s1129_s4 + $0x40] sm:$0xff] }
  0x7e   :  { %v311_v20 = vpop.permute.xlu0 %310  ;;  %v300_v0 = vpop.permute.xlu1 %299 }
  0x7f   :  { %vm315_vm9 = vcmp.eq.s32.totalorder %v311_v20, %v289_v9  ;;  %vm313_vm10 = vcmp.eq.s32.totalorder %v300_v0, %v289_v9  ;;  %v548_v9 = vld [vmem:[%s1129_s4 + $0x78] sm:$0xff]  ;;  %v539_v0 = vld [vmem:[%s1129_s4 + $0x30] sm:$0xff] }
  0x80   :  { %v651_v24 = vsel %vm315_vm9, 1.0, %v687_v2  ;;  %v649_v25 = vsel %vm313_vm10, 1.0, %v687_v2  ;;  %564 = vmatpush1.msra.mxu1 %v548_v9  ;;  %v540_v20 = vld [vmem:[%s1129_s4 + $0x38] sm:$0xff] }
  0x81   :  { %v336_v29 = vsel %vm326_vm8, %v651_v24, 0.0  ;;  %v327_v30 = vsel %vm326_vm8, %v649_v25, 0.0  ;;  %565 = vmatprep.subr.mxu1 %v687_v2 }
  0x82   :  { %v337_v31 = vadd.f32 %v336_v29, %v335_v27  ;;  %v328_v1 = vadd.f32 %v327_v30, %v325_v28  ;;  %v537_v27 = vld [vmem:[%s1129_s4 + $0x20] sm:$0xff]  ;;  %v536_v28 = vld [vmem:[%s1129_s4 + $0x18] sm:$0xff]  ;;  %v535_v29 = vld [vmem:[%s1129_s4 + $0x10] sm:$0xff] }
  0x83   :  { %v534_v30 = vld [vmem:[%s1129_s4 + $0x8] sm:$0xff] }
  0x84   :  { %v338_v34 = vrot.slane %v337_v31, 4  ;;  %v329_v35 = vrot.slane %v328_v1, 4  ;;  %v101_v37 = vpop.permute.xlu0 %100 }
  0x85   :  { %104 = vst.msk [vmem:[#allocation2] sm:$0x3] %vm103_vm11, %v101_v37 }
  0x86   :  { %v339_v38 = vadd.f32 %v338_v34, %v337_v31  ;;  %v330_v39 = vadd.f32 %v329_v35, %v328_v1  ;;  %v533_v31 = vld [vmem:[%s1129_s4] sm:$0xff]  ;;  %v552_v1 = vld [vmem:[%s1129_s4 + $0x98] sm:$0xff] }
  0x87   :  { %v549_v34 = vld [vmem:[%s1129_s4 + $0x80] sm:$0xff] }
  0x88   :  { %v340_v42 = vrot.slane %v339_v38, 2  ;;  %v331_v43 = vrot.slane %v330_v39, 2  ;;  %v437_v35 = vld [vmem:[%s1128_s3] sm:$0x3]  ;;  %s692_s3 = smov [#allocation3]  }
  0x89   :  { %v173_v49 = vpop.permute.xlu1 %172  ;;  %v442_v36 = vrot.slane %v437_v35, %v292_v11  ;;  %v446_v37 = vrot.slane %v437_v35, %v303_v10  ;;  %s640_s21 = sshll.u32 %s692_s3, 4  ;;  %s641_s21 = int_to_ptr.vmem [resolvable:$true] %s640_s21 }
  0x8a   :  { %v341_v46 = vadd.f32 %v340_v42, %v339_v38  ;;  %v332_v47 = vadd.f32 %v331_v43, %v330_v39  ;;  %176 = vst.msk [vmem:[#allocation2] sm:$0x3] %vm175_vm12, %v173_v49  ;;  %s665_s22 = scalar_lea.vmem %s641_s21, 32  ;;  %p670_p1 = scmp.lt.s32.totalorder %s641_s21, %s641_s21 }
  0x8b   :  { %p666_p0 = scmp.ne.s32.totalorder %s641_s21, %s665_s22  ;;  %p671_p2 = scmp.lt.s32.totalorder %s665_s22, %s665_s22 }
  0x8c   :  { %v342_v51 = vrot.slane %v341_v46, 1  ;;  %v333_v52 = vrot.slane %v332_v47, 1 }
  0x8d   :  { %p672_p3 = por %p671_p2, %p670_p1 }
  0x8e   :  { %v343_v55 = vadd.f32 %v342_v51, %v341_v46  ;;  %v334_v56 = vadd.f32 %v333_v52, %v332_v47 }
  0x8f   :  { %p673_p4 = pnand %p672_p3, %p666_p0 }
  0x90   :  { %v359_v59 = vrot.slane %v343_v55, %v757_v21  ;;  %v352_v62 = vrot.slane %v334_v56, %v757_v21  ;;  %v547_v21 = vld [vmem:[%s1129_s4 + $0x70] sm:$0xff] }
  0x91   :  { %566 = vmatpush1.msra.mxu1 %v547_v21 }
  0x92   :  { %v362_v63 = vrot.slane %v359_v59, 7  ;;  %567 = vmatprep.subr.mxu1 %v687_v2 }
  0x93   :  { %568 = vmatpush1.msra.mxu1 %v546_v13 }
  0x94   :  { %v363_v6 = vsel %vm66_vm1, %v362_v63, %v352_v62  ;;  %569 = vmatprep.subr.mxu1 %v687_v2  ;;  %vm245_vm1 = vcmask 1042176  }
  0x95   :  { %v364_v7 = vsel %vm68_vm2, %v362_v63, %v363_v6  ;;  %570 = vmatpush1.msra.mxu1 %v545_v14  ;;  %vm370_vm2 = vcmask 386304  }
  0x96   :  { %v365_v8 = vsel %vm70_vm4, %v362_v63, %v364_v7  ;;  %571 = vmatprep.subr.mxu1 %v687_v2 }
  0x97   :  { %v366_v12 = vsel %vm72_vm5, %v362_v63, %v365_v8  ;;  %572 = vmatpush1.msra.mxu1 %v544_v15 }
  0x98   :  { %367 = vrot.lane.b32.xlu1 %v366_v12, %s689_s0  ;;  %573 = vmatprep.subr.mxu1 %v687_v2 }
  0x99   :  { %574 = vmatpush1.msra.mxu1 %v543_v16 }
  0x9a   :  { %575 = vmatprep.subr.mxu1 %v687_v2 }
  0x9b   :  { %576 = vmatpush1.msra.mxu1 %v542_v18 }
  0x9c   :  { %577 = vmatprep.subr.mxu1 %v687_v2 }
  0x9d   :  { %578 = vmatpush1.msra.mxu1 %v541_v19 }
  0x9e   :  { %579 = vmatprep.subr.mxu1 %v687_v2 }
  0x9f   :  { %580 = vmatpush1.msra.mxu1 %v540_v20 }
  0xa0   :  { %581 = vmatprep.subr.mxu1 %v687_v2 }
  0xa1   :  { %582 = vmatpush1.msra.mxu1 %v539_v0 }
  0xa2   :  { %583 = vmatprep.subr.mxu1 %v687_v2 }
  0xa3   :  { %584 = vmatpush1.msra.mxu1 %v538_v26 }
  0xa4   :  { %585 = vmatprep.subr.mxu1 %v687_v2 }
  0xa5   :  { %586 = vmatpush1.msra.mxu1 %v537_v27 }
  0xa6   :  { %587 = vmatprep.subr.mxu1 %v687_v2 }
  0xa7   :  { %v243_v22 = vpop.permute.xlu0 %242  ;;  %588 = vmatpush1.msra.mxu1 %v536_v28 }
  0xa8   :  { %246 = vst.msk [vmem:[#allocation2] sm:$0x3] %vm245_vm1, %v243_v22  ;;  %589 = vmatprep.subr.mxu1 %v687_v2 }
  0xa9   :  { %590 = vmatpush1.msra.mxu1 %v535_v29 }
  0xaa   :  { %591 = vmatprep.subr.mxu1 %v687_v2 }
  0xab   :  { %592 = vmatpush1.msra.mxu1 %v534_v30 }
  0xac   :  { %593 = vmatprep.subr.mxu1 %v687_v2 }
  0xad   :  { %594 = vmatpush1.msra.mxu1 %v533_v31 }
  0xae   :  { %619 = vmatprep.subr.mxu1 %v687_v2 }
  0xaf   :  { %620 = vmatpush2.msra.mxu1 %v552_v1 }
  0xb0   :  { %621 = vmatprep.subr.mxu1 %v687_v2 }
  0xb1   :  { %622 = vmatpush2.msra.mxu1 %v551_v32 }
  0xb2   :  { %623 = vmatprep.subr.mxu1 %v687_v2 }
  0xb3   :  { %624 = vmatpush2.msra.mxu1 %v550_v33 }
  0xb4   :  { %625 = vmatprep.subr.mxu1 %v687_v2  ;;  %v653_v2 = vld [vmem:[%s1130_s5] ss:$0 sm:$0xff] }
  0xb5   :  { %626 = vmatpush2.msra.mxu1 %v549_v34 }
 0x10a   :  { %v368_v23 = vpop.permute.xlu1 %367 }
 0x10b   :  { %371 = vst.msk [vmem:[#allocation2 + $0x2] sm:$0x3] %vm370_vm2, %v368_v23 }
 0x112   :  { %v652_v24 = vld.sshfl [vmem:[#allocation2] sm:$0x33 pattern:$0x76325410] }
 0x113   :  { %v457_v25 = vcombine.high %v652_v24, %v652_v24 }
 0x115   :  { %524 = vmatprep.mubr.f32.mxu0 %v457_v25 }
 0x116   :  { %525 = vmatmul.mubr.f32.vlgmr.msra.gmra.mxu0 %v652_v24 }
 0x1d6   :  { %v526_v38 = vpop.f32.mrf.mxu0 }
 0x1d7   :  { %v527_v39 = vadd.f32 %v526_v38, %v442_v36 }
 0x1d8   :  { %v528_v40 = vpop.f32.mrf.mxu0 }
 0x1d9   :  { %v529_v41 = vadd.f32 %v528_v40, %v446_v37 }
 0x1db   :  { %661 = vtanh.f32 %v529_v41 }
 0x1dc   :  { %663 = vtanh.f32 %v527_v39 }
 0x1e8   :  { %v662_v42 = vpop.eup %661 }
 0x1e9   :  { %v664_v43 = vpop.eup %663  ;;  %654 = vmatprep.mubr.msk.f32.mxu1 %vm27_vm0, %v662_v42 }
 0x1ea   :  { %628 = vmatmul.mubr.f32.vlgmr.msra.gmra.mxu1 %v664_v43 }
 0x2aa   :  { %v629_v11 = vpop.f32.mrf.mxu1 }
 0x2ab   :  { %v630_v4 = vadd.f32 %v653_v2, %v629_v11 }
 0x2ac   :  { %v631_v10 = vpop.f32.mrf.mxu1 }
 0x2ad   :  { %633 = vst [vmem:[#allocation3] sm:$0x3] %v630_v4 }
 0x2ae   :  { %676 = shalt.err (!%p673_p4)
}
 0x2af   :  { %643 = dma.vmem_to_hbm [thread:$0]  %s641_s21, 32, %s1131_s6, [#allocation4]  }
 0x2b0   :  { %685 = dma.done.wait [#allocation4], 32  }
 0x2b1   :  { %686 = vsyncadd [#allocation4], 4294967264 }
 0x2b2   :  { %647 = vsyncpa [#allocation4], 1 }

</bundles_post_ra>
